<compile_context>
chip_gen: v7x
topology: tpu7x:2x2x1
jax: 0.10.0
libtpu: 0.0.40
codegen_flags: <defaults>
</compile_context>

<pallas_src>
import functools

import jax
import jax.numpy as jnp
from jax import lax
from jax.experimental import pallas as pl
from jax.experimental.pallas import tpu as pltpu


# --------------------------------------------------------------------------
# Kernels
# --------------------------------------------------------------------------

def _conv_accumulate(w_ref, x_ref, *, ksize, stride, hout, wout):
    """Shifted-matmul conv for one image / one Cout tile.

    w_ref : [K, K, tc, Cin]   bf16 weights (contraction over trailing Cin)
    x_ref : [1, Hp, Wp, Cin]  f32 padded NHWC image
    returns f32 [tc, hout*wout]  (channels on sublanes, spatial on lanes)
    """
    m = hout * wout
    cin = w_ref.shape[-1]
    tc = w_ref.shape[-2]
    acc = jnp.zeros((tc, m), jnp.float32)
    for kh in range(ksize):
        for kw in range(ksize):
            if stride == 1:
                xs = x_ref[0, kh:kh + hout, kw:kw + wout, :]
            else:
                # TODO(synk): stride > 1 path uses strided VMEM window reads;
                # untested on real HW (the test below uses stride=1).
                xs = x_ref[0, pl.ds(kh, hout, stride=stride),
                           pl.ds(kw, wout, stride=stride), :]
            # [hout, wout, cin] -> [m, cin]: layout-trivial merge of the
            # leading dim into sublanes when wout % 8 == 0 (true here).
            xs2 = xs.reshape(m, cin).astype(jnp.bfloat16)
            wk = w_ref[kh, kw]                       # [tc, cin] bf16
            # A @ B^T form (contract both operands on Cin) -> [tc, m];
            # native MXU path, no transposes materialized, lane-dense output.
            acc = acc + lax.dot_general(
                wk, xs2,
                dimension_numbers=(((1,), (1,)), ((), ())),
                preferred_element_type=jnp.float32)
    return acc


def _conv_stats_kernel(w_ref, x_ref, y_ref, s1_ref, s2_ref, *,
                       ksize, stride, hout, wout):
    """Pass 1 (bn_act=True): conv output + per-channel sum / sum-of-squares."""
    acc = _conv_accumulate(w_ref, x_ref, ksize=ksize, stride=stride,
                           hout=hout, wout=wout)
    y_ref[0] = acc.astype(y_ref.dtype)
    # Lane-axis reductions (XLU) fused with the conv: partial BN statistics.
    s1_ref[0] = jnp.sum(acc, axis=1, keepdims=True)
    s2_ref[0] = jnp.sum(acc * acc, axis=1, keepdims=True)


def _conv_bias_kernel(w_ref, b_ref, x_ref, o_ref, *, ksize, stride, hout, wout):
    """Single pass (bn_act=False): conv + bias."""
    acc = _conv_accumulate(w_ref, x_ref, ksize=ksize, stride=stride,
                           hout=hout, wout=wout)
    o_ref[0] = (acc + b_ref[...]).astype(o_ref.dtype)


def _bn_leaky_kernel(y_ref, scale_ref, shift_ref, o_ref, *, neg_slope):
    """Pass 2 (bn_act=True): per-channel affine (folded BN) + LeakyReLU."""
    z = y_ref[0] * scale_ref[...] + shift_ref[...]
    o_ref[0] = jnp.where(z >= 0, z, neg_slope * z).astype(o_ref.dtype)


# --------------------------------------------------------------------------
# Wrapper
# --------------------------------------------------------------------------

def cnn_block_forward(x, params, *, ksize=3, stride=1, padding=1, bn_act=True,
                      eps=1e-5, neg_slope=0.1, cout_tile=256, m_tile=2048):
    """Pallas implementation of CNNBlock.forward. x: [N, Cin, H, W] (NCHW)."""
    n, cin, h, w_sp = x.shape
    w = params["conv_w"]                              # [Cout, Cin, K, K]
    cout = w.shape[0]
    k = ksize
    hout = (h + 2 * padding - k) // stride + 1
    wout = (w_sp + 2 * padding - k) // stride + 1
    m = hout * wout
    hp, wp = h + 2 * padding, w_sp + 2 * padding

    # One padded NHWC copy of the input (no K*K-inflated im2col buffer).
    x_pad = jnp.pad(jnp.transpose(x, (0, 2, 3, 1)).astype(jnp.float32),
                    ((0, 0), (padding, padding), (padding, padding), (0, 0)))
    # Weight as [K, K, Cout, Cin], pre-cast to bf16 for single-pass MXU.
    w_kk = jnp.transpose(w, (2, 3, 0, 1)).astype(jnp.bfloat16)

    # Cout tiling: matches MXU geometry for real YOLO layers; whole Cout
    # otherwise (always a multiple of 8 or the full dim -> (8,128)-legal).
    tc = cout_tile if (cout % cout_tile == 0) else cout
    n_ct = cout // tc

    cparams = pltpu.CompilerParams(
        dimension_semantics=("parallel", "parallel"),
        vmem_limit_bytes=64 * 1024 * 1024,            # v7x physical VMEM budget
    )

    if bn_act:
        # ---- Pass 1: conv + per-channel partial statistics --------------
        y, s1, s2 = pl.pallas_call(
            functools.partial(_conv_stats_kernel, ksize=k, stride=stride,
                              hout=hout, wout=wout),
            out_shape=(jax.ShapeDtypeStruct((n, cout, m), jnp.float32),
                       jax.ShapeDtypeStruct((n, cout, 1), jnp.float32),
                       jax.ShapeDtypeStruct((n, cout, 1), jnp.float32)),
            grid_spec=pltpu.PrefetchScalarGridSpec(
                num_scalar_prefetch=0,
                grid=(n, n_ct),
                in_specs=[
                    pl.BlockSpec((k, k, tc, cin), lambda b, c: (0, 0, c, 0)),
                    pl.BlockSpec((1, hp, wp, cin), lambda b, c: (b, 0, 0, 0)),
                ],
                out_specs=[
                    pl.BlockSpec((1, tc, m), lambda b, c: (b, c, 0)),
                    pl.BlockSpec((1, tc, 1), lambda b, c: (b, c, 0)),
                    pl.BlockSpec((1, tc, 1), lambda b, c: (b, c, 0)),
                ],
            ),
            compiler_params=cparams,
        )(w_kk, x_pad)

        # ---- Tiny [Cout] batch-statistics math in plain JAX --------------
        count = n * m
        mean = jnp.sum(s1[:, :, 0], axis=0) / count
        var = jnp.sum(s2[:, :, 0], axis=0) / count - mean * mean   # biased var
        # TODO(synk): use Welford / centered accumulation if N*H*W grows to
        #             real-YOLO sizes and sum-of-squares cancellation matters.
        inv = lax.rsqrt(var + eps)
        scale = (params["bn_gamma"] * inv).astype(jnp.float32).reshape(cout, 1)
        shift = (params["bn_beta"] - params["bn_gamma"] * mean * inv)
        shift = shift.astype(jnp.float32).reshape(cout, 1)

        # ---- Pass 2: elementwise BN-apply + LeakyReLU, lane-dense tiles --
        tm = m if m <= m_tile else m_tile
        out = pl.pallas_call(
            functools.partial(_bn_leaky_kernel, neg_slope=neg_slope),
            out_shape=jax.ShapeDtypeStruct((n, cout, m), jnp.float32),
            grid_spec=pltpu.PrefetchScalarGridSpec(
                num_scalar_prefetch=0,
                grid=(n, pl.cdiv(m, tm)),
                in_specs=[
                    pl.BlockSpec((1, cout, tm), lambda b, j: (b, 0, j)),
                    # scale/shift hoisted: index_map independent of the grid.
                    pl.BlockSpec((cout, 1), lambda b, j: (0, 0)),
                    pl.BlockSpec((cout, 1), lambda b, j: (0, 0)),
                ],
                out_specs=pl.BlockSpec((1, cout, tm), lambda b, j: (b, 0, j)),
            ),
            compiler_params=cparams,
        )(y, scale, shift)
    else:
        bias = params["conv_b"].astype(jnp.float32).reshape(cout, 1)
        out = pl.pallas_call(
            functools.partial(_conv_bias_kernel, ksize=k, stride=stride,
                              hout=hout, wout=wout),
            out_shape=jax.ShapeDtypeStruct((n, cout, m), jnp.float32),
            grid_spec=pltpu.PrefetchScalarGridSpec(
                num_scalar_prefetch=0,
                grid=(n, n_ct),
                in_specs=[
                    pl.BlockSpec((k, k, tc, cin), lambda b, c: (0, 0, c, 0)),
                    pl.BlockSpec((tc, 1), lambda b, c: (c, 0)),
                    pl.BlockSpec((1, hp, wp, cin), lambda b, c: (b, 0, 0, 0)),
                ],
                out_specs=pl.BlockSpec((1, tc, m), lambda b, c: (b, c, 0)),
            ),
            compiler_params=cparams,
        )(w_kk, bias, x_pad)

    # [N, Cout, Hout*Wout] -> NCHW is a free reshape (no HBM transpose).
    return out.reshape(n, cout, hout, wout)


# --------------------------------------------------------------------------
# Pure-JAX reference (matches nn.Conv2d + nn.BatchNorm2d(train) + LeakyReLU)
# --------------------------------------------------------------------------

def cnn_block_reference(x, params, *, ksize=3, stride=1, padding=1, bn_act=True,
                        eps=1e-5, neg_slope=0.1, operand_dtype=jnp.float32):
    """operand_dtype=bf16 mirrors the kernel's bf16 MXU operands (f32 accum)."""
    w = params["conv_w"].astype(operand_dtype).astype(jnp.float32)
    xx = x.astype(operand_dtype).astype(jnp.float32)
    y = lax.conv_general_dilated(
        xx, w, window_strides=(stride, stride),
        padding=[(padding, padding), (padding, padding)],
        dimension_numbers=("NCHW", "OIHW", "NCHW"),
        precision=lax.Precision.HIGHEST,
    )
    if bn_act:
        mean = jnp.mean(y, axis=(0, 2, 3), keepdims=True)
        var = jnp.mean((y - mean) ** 2, axis=(0, 2, 3), keepdims=True)
        y_hat = (y - mean) * lax.rsqrt(var + eps)
        g = params["bn_gamma"].reshape(1, -1, 1, 1)
        b = params["bn_beta"].reshape(1, -1, 1, 1)
        z = g * y_hat + b
        return jnp.where(z >= 0, z, neg_slope * z)
    return y + params["conv_b"].reshape(1, -1, 1, 1)


if __name__ == "__main__":
    # CNNBlock(4, 8, bn_act=..., kernel_size=3, stride=1, padding=1),
    # input NCHW [2, 4, 16, 16].
    N, CIN, COUT, H, W, K, S, P = 2, 4, 8, 16, 16, 3, 1, 1

    key = jax.random.PRNGKey(0)
    kx, kw, kb, kg, kbt = jax.random.split(key, 5)
    x = jax.random.normal(kx, (N, CIN, H, W), dtype=jnp.float32)
    params = {
        "conv_w": 0.1 * jax.random.normal(kw, (COUT, CIN, K, K), dtype=jnp.float32),
        "conv_b": 0.1 * jax.random.normal(kb, (COUT,), dtype=jnp.float32),
        "bn_gamma": 1.0 + 0.1 * jax.random.normal(kg, (COUT,), dtype=jnp.float32),
        "bn_beta": 0.1 * jax.random.normal(kbt, (COUT,), dtype=jnp.float32),
    }

    for bn_act in (True, False):
        out = cnn_block_forward(x, params, ksize=K, stride=S, padding=P,
                                bn_act=bn_act)
        out = jax.block_until_ready(out)
        assert out.shape == (N, COUT, H, W)

        # Tight check against a reference with the same bf16 operand rounding.
        ref_bf16 = cnn_block_reference(x, params, ksize=K, stride=S, padding=P,
                                       bn_act=bn_act,
                                       operand_dtype=jnp.bfloat16)
        assert jnp.allclose(out, ref_bf16, atol=1e-3, rtol=1e-3), \
            f"bn_act={bn_act}: mismatch vs bf16-operand reference"

        # Looser end-to-end sanity check against the full-f32 reference
        # (difference is purely the intentional bf16 MXU operand rounding).
        ref_f32 = cnn_block_reference(x, params, ksize=K, stride=S, padding=P,
                                      bn_act=bn_act,
                                      operand_dtype=jnp.float32)
        assert jnp.allclose(out, ref_f32, atol=5e-2, rtol=5e-2), \
            f"bn_act={bn_act}: mismatch vs f32 reference"

    print("KERNEL_OK")
</pallas_src>

<mosaic_0001>
module attributes {stable_mosaic.version = 11 : i64} {
  func.func @_conv_stats_kernel(%arg0: i32, %arg1: i32, %arg2: memref<3x3x8x4xbf16, #tpu.memory_space<vmem>>, %arg3: memref<1x18x18x4xf32, #tpu.memory_space<vmem>>, %arg4: memref<1x8x256xf32, #tpu.memory_space<vmem>>, %arg5: memref<1x8x1xf32, #tpu.memory_space<vmem>>, %arg6: memref<1x8x1xf32, #tpu.memory_space<vmem>>) attributes {dimension_semantics = [#tpu.dimension_semantics<parallel>, #tpu.dimension_semantics<parallel>], iteration_bounds = array<i64: 2, 1>, scalar_prefetch = 0 : i64, scratch_operands = 0 : i64, tpu.core_type = #tpu.core_type<tc>, window_params = [{transform_indices = @transform_0, window_bounds = array<i64: 3, 3, 8, 4>}, {transform_indices = @transform_1, window_bounds = array<i64: 1, 18, 18, 4>}, {transform_indices = @transform_2, window_bounds = array<i64: 1, 8, 256>}, {transform_indices = @transform_3, window_bounds = array<i64: 1, 8, 1>}, {transform_indices = @transform_4, window_bounds = array<i64: 1, 8, 1>}]} {
    %cst = arith.constant 0.000000e+00 : f32
    %0 = vector.broadcast %cst : f32 to vector<8x256xf32>
    %c0 = arith.constant 0 : index
    %c0_0 = arith.constant 0 : index
    %c0_1 = arith.constant 0 : index
    %c0_2 = arith.constant 0 : index
    %1 = vector.load %arg3[%c0, %c0_0, %c0_1, %c0_2] : memref<1x18x18x4xf32, #tpu.memory_space<vmem>>, vector<1x16x16x4xf32>
    %2 = vector.shape_cast %1 : vector<1x16x16x4xf32> to vector<16x16x4xf32>
    %3 = vector.shape_cast %2 : vector<16x16x4xf32> to vector<256x4xf32>
    %4 = arith.truncf %3 : vector<256x4xf32> to vector<256x4xbf16>
    %c0_3 = arith.constant 0 : index
    %c0_4 = arith.constant 0 : index
    %c0_5 = arith.constant 0 : index
    %c0_6 = arith.constant 0 : index
    %5 = vector.load %arg2[%c0_3, %c0_4, %c0_5, %c0_6] : memref<3x3x8x4xbf16, #tpu.memory_space<vmem>>, vector<1x1x8x4xbf16>
    %6 = vector.shape_cast %5 : vector<1x1x8x4xbf16> to vector<8x4xbf16>
    %cst_7 = arith.constant dense<0.000000e+00> : vector<8x256xf32>
    %7 = tpu.matmul %6, %4, %cst_7 {dimension_numbers = #tpu.dot_dimension_numbers<[1], [1], [0], [0], [0, 0, 1, 0], [], []>} : vector<8x4xbf16>, vector<256x4xbf16>, vector<8x256xf32> -> vector<8x256xf32>
    %8 = arith.addf %0, %7 : vector<8x256xf32>
    %c0_8 = arith.constant 0 : index
    %c0_9 = arith.constant 0 : index
    %c1 = arith.constant 1 : index
    %c0_10 = arith.constant 0 : index
    %9 = vector.load %arg3[%c0_8, %c0_9, %c1, %c0_10] : memref<1x18x18x4xf32, #tpu.memory_space<vmem>>, vector<1x16x16x4xf32>
    %10 = vector.shape_cast %9 : vector<1x16x16x4xf32> to vector<16x16x4xf32>
    %11 = vector.shape_cast %10 : vector<16x16x4xf32> to vector<256x4xf32>
    %12 = arith.truncf %11 : vector<256x4xf32> to vector<256x4xbf16>
    %c0_11 = arith.constant 0 : index
    %c1_12 = arith.constant 1 : index
    %c0_13 = arith.constant 0 : index
    %c0_14 = arith.constant 0 : index
    %13 = vector.load %arg2[%c0_11, %c1_12, %c0_13, %c0_14] : memref<3x3x8x4xbf16, #tpu.memory_space<vmem>>, vector<1x1x8x4xbf16>
    %14 = vector.shape_cast %13 : vector<1x1x8x4xbf16> to vector<8x4xbf16>
    %cst_15 = arith.constant dense<0.000000e+00> : vector<8x256xf32>
    %15 = tpu.matmul %14, %12, %cst_15 {dimension_numbers = #tpu.dot_dimension_numbers<[1], [1], [0], [0], [0, 0, 1, 0], [], []>} : vector<8x4xbf16>, vector<256x4xbf16>, vector<8x256xf32> -> vector<8x256xf32>
    %16 = arith.addf %8, %15 : vector<8x256xf32>
    %c0_16 = arith.constant 0 : index
    %c0_17 = arith.constant 0 : index
    %c2 = arith.constant 2 : index
    %c0_18 = arith.constant 0 : index
    %17 = vector.load %arg3[%c0_16, %c0_17, %c2, %c0_18] : memref<1x18x18x4xf32, #tpu.memory_space<vmem>>, vector<1x16x16x4xf32>
    %18 = vector.shape_cast %17 : vector<1x16x16x4xf32> to vector<16x16x4xf32>
    %19 = vector.shape_cast %18 : vector<16x16x4xf32> to vector<256x4xf32>
    %20 = arith.truncf %19 : vector<256x4xf32> to vector<256x4xbf16>
    %c0_19 = arith.constant 0 : index
    %c2_20 = arith.constant 2 : index
    %c0_21 = arith.constant 0 : index
    %c0_22 = arith.constant 0 : index
    %21 = vector.load %arg2[%c0_19, %c2_20, %c0_21, %c0_22] : memref<3x3x8x4xbf16, #tpu.memory_space<vmem>>, vector<1x1x8x4xbf16>
    %22 = vector.shape_cast %21 : vector<1x1x8x4xbf16> to vector<8x4xbf16>
    %cst_23 = arith.constant dense<0.000000e+00> : vector<8x256xf32>
    %23 = tpu.matmul %22, %20, %cst_23 {dimension_numbers = #tpu.dot_dimension_numbers<[1], [1], [0], [0], [0, 0, 1, 0], [], []>} : vector<8x4xbf16>, vector<256x4xbf16>, vector<8x256xf32> -> vector<8x256xf32>
    %24 = arith.addf %16, %23 : vector<8x256xf32>
    %c0_24 = arith.constant 0 : index
    %c1_25 = arith.constant 1 : index
    %c0_26 = arith.constant 0 : index
    %c0_27 = arith.constant 0 : index
    %25 = vector.load %arg3[%c0_24, %c1_25, %c0_26, %c0_27] : memref<1x18x18x4xf32, #tpu.memory_space<vmem>>, vector<1x16x16x4xf32>
    %26 = vector.shape_cast %25 : vector<1x16x16x4xf32> to vector<16x16x4xf32>
    %27 = vector.shape_cast %26 : vector<16x16x4xf32> to vector<256x4xf32>
    %28 = arith.truncf %27 : vector<256x4xf32> to vector<256x4xbf16>
    %c1_28 = arith.constant 1 : index
    %c0_29 = arith.constant 0 : index
    %c0_30 = arith.constant 0 : index
    %c0_31 = arith.constant 0 : index
    %29 = vector.load %arg2[%c1_28, %c0_29, %c0_30, %c0_31] : memref<3x3x8x4xbf16, #tpu.memory_space<vmem>>, vector<1x1x8x4xbf16>
    %30 = vector.shape_cast %29 : vector<1x1x8x4xbf16> to vector<8x4xbf16>
    %cst_32 = arith.constant dense<0.000000e+00> : vector<8x256xf32>
    %31 = tpu.matmul %30, %28, %cst_32 {dimension_numbers = #tpu.dot_dimension_numbers<[1], [1], [0], [0], [0, 0, 1, 0], [], []>} : vector<8x4xbf16>, vector<256x4xbf16>, vector<8x256xf32> -> vector<8x256xf32>
    %32 = arith.addf %24, %31 : vector<8x256xf32>
    %c0_33 = arith.constant 0 : index
    %c1_34 = arith.constant 1 : index
    %c1_35 = arith.constant 1 : index
    %c0_36 = arith.constant 0 : index
    %33 = vector.load %arg3[%c0_33, %c1_34, %c1_35, %c0_36] : memref<1x18x18x4xf32, #tpu.memory_space<vmem>>, vector<1x16x16x4xf32>
    %34 = vector.shape_cast %33 : vector<1x16x16x4xf32> to vector<16x16x4xf32>
    %35 = vector.shape_cast %34 : vector<16x16x4xf32> to vector<256x4xf32>
    %36 = arith.truncf %35 : vector<256x4xf32> to vector<256x4xbf16>
    %c1_37 = arith.constant 1 : index
    %c1_38 = arith.constant 1 : index
    %c0_39 = arith.constant 0 : index
    %c0_40 = arith.constant 0 : index
    %37 = vector.load %arg2[%c1_37, %c1_38, %c0_39, %c0_40] : memref<3x3x8x4xbf16, #tpu.memory_space<vmem>>, vector<1x1x8x4xbf16>
    %38 = vector.shape_cast %37 : vector<1x1x8x4xbf16> to vector<8x4xbf16>
    %cst_41 = arith.constant dense<0.000000e+00> : vector<8x256xf32>
    %39 = tpu.matmul %38, %36, %cst_41 {dimension_numbers = #tpu.dot_dimension_numbers<[1], [1], [0], [0], [0, 0, 1, 0], [], []>} : vector<8x4xbf16>, vector<256x4xbf16>, vector<8x256xf32> -> vector<8x256xf32>
    %40 = arith.addf %32, %39 : vector<8x256xf32>
    %c0_42 = arith.constant 0 : index
    %c1_43 = arith.constant 1 : index
    %c2_44 = arith.constant 2 : index
    %c0_45 = arith.constant 0 : index
    %41 = vector.load %arg3[%c0_42, %c1_43, %c2_44, %c0_45] : memref<1x18x18x4xf32, #tpu.memory_space<vmem>>, vector<1x16x16x4xf32>
    %42 = vector.shape_cast %41 : vector<1x16x16x4xf32> to vector<16x16x4xf32>
    %43 = vector.shape_cast %42 : vector<16x16x4xf32> to vector<256x4xf32>
    %44 = arith.truncf %43 : vector<256x4xf32> to vector<256x4xbf16>
    %c1_46 = arith.constant 1 : index
    %c2_47 = arith.constant 2 : index
    %c0_48 = arith.constant 0 : index
    %c0_49 = arith.constant 0 : index
    %45 = vector.load %arg2[%c1_46, %c2_47, %c0_48, %c0_49] : memref<3x3x8x4xbf16, #tpu.memory_space<vmem>>, vector<1x1x8x4xbf16>
    %46 = vector.shape_cast %45 : vector<1x1x8x4xbf16> to vector<8x4xbf16>
    %cst_50 = arith.constant dense<0.000000e+00> : vector<8x256xf32>
    %47 = tpu.matmul %46, %44, %cst_50 {dimension_numbers = #tpu.dot_dimension_numbers<[1], [1], [0], [0], [0, 0, 1, 0], [], []>} : vector<8x4xbf16>, vector<256x4xbf16>, vector<8x256xf32> -> vector<8x256xf32>
    %48 = arith.addf %40, %47 : vector<8x256xf32>
    %c0_51 = arith.constant 0 : index
    %c2_52 = arith.constant 2 : index
    %c0_53 = arith.constant 0 : index
    %c0_54 = arith.constant 0 : index
    %49 = vector.load %arg3[%c0_51, %c2_52, %c0_53, %c0_54] : memref<1x18x18x4xf32, #tpu.memory_space<vmem>>, vector<1x16x16x4xf32>
    %50 = vector.shape_cast %49 : vector<1x16x16x4xf32> to vector<16x16x4xf32>
    %51 = vector.shape_cast %50 : vector<16x16x4xf32> to vector<256x4xf32>
    %52 = arith.truncf %51 : vector<256x4xf32> to vector<256x4xbf16>
    %c2_55 = arith.constant 2 : index
    %c0_56 = arith.constant 0 : index
    %c0_57 = arith.constant 0 : index
    %c0_58 = arith.constant 0 : index
    %53 = vector.load %arg2[%c2_55, %c0_56, %c0_57, %c0_58] : memref<3x3x8x4xbf16, #tpu.memory_space<vmem>>, vector<1x1x8x4xbf16>
    %54 = vector.shape_cast %53 : vector<1x1x8x4xbf16> to vector<8x4xbf16>
    %cst_59 = arith.constant dense<0.000000e+00> : vector<8x256xf32>
    %55 = tpu.matmul %54, %52, %cst_59 {dimension_numbers = #tpu.dot_dimension_numbers<[1], [1], [0], [0], [0, 0, 1, 0], [], []>} : vector<8x4xbf16>, vector<256x4xbf16>, vector<8x256xf32> -> vector<8x256xf32>
    %56 = arith.addf %48, %55 : vector<8x256xf32>
    %c0_60 = arith.constant 0 : index
    %c2_61 = arith.constant 2 : index
    %c1_62 = arith.constant 1 : index
    %c0_63 = arith.constant 0 : index
    %57 = vector.load %arg3[%c0_60, %c2_61, %c1_62, %c0_63] : memref<1x18x18x4xf32, #tpu.memory_space<vmem>>, vector<1x16x16x4xf32>
    %58 = vector.shape_cast %57 : vector<1x16x16x4xf32> to vector<16x16x4xf32>
    %59 = vector.shape_cast %58 : vector<16x16x4xf32> to vector<256x4xf32>
    %60 = arith.truncf %59 : vector<256x4xf32> to vector<256x4xbf16>
    %c2_64 = arith.constant 2 : index
    %c1_65 = arith.constant 1 : index
    %c0_66 = arith.constant 0 : index
    %c0_67 = arith.constant 0 : index
    %61 = vector.load %arg2[%c2_64, %c1_65, %c0_66, %c0_67] : memref<3x3x8x4xbf16, #tpu.memory_space<vmem>>, vector<1x1x8x4xbf16>
    %62 = vector.shape_cast %61 : vector<1x1x8x4xbf16> to vector<8x4xbf16>
    %cst_68 = arith.constant dense<0.000000e+00> : vector<8x256xf32>
    %63 = tpu.matmul %62, %60, %cst_68 {dimension_numbers = #tpu.dot_dimension_numbers<[1], [1], [0], [0], [0, 0, 1, 0], [], []>} : vector<8x4xbf16>, vector<256x4xbf16>, vector<8x256xf32> -> vector<8x256xf32>
    %64 = arith.addf %56, %63 : vector<8x256xf32>
    %c0_69 = arith.constant 0 : index
    %c2_70 = arith.constant 2 : index
    %c2_71 = arith.constant 2 : index
    %c0_72 = arith.constant 0 : index
    %65 = vector.load %arg3[%c0_69, %c2_70, %c2_71, %c0_72] : memref<1x18x18x4xf32, #tpu.memory_space<vmem>>, vector<1x16x16x4xf32>
    %66 = vector.shape_cast %65 : vector<1x16x16x4xf32> to vector<16x16x4xf32>
    %67 = vector.shape_cast %66 : vector<16x16x4xf32> to vector<256x4xf32>
    %68 = arith.truncf %67 : vector<256x4xf32> to vector<256x4xbf16>
    %c2_73 = arith.constant 2 : index
    %c2_74 = arith.constant 2 : index
    %c0_75 = arith.constant 0 : index
    %c0_76 = arith.constant 0 : index
    %69 = vector.load %arg2[%c2_73, %c2_74, %c0_75, %c0_76] : memref<3x3x8x4xbf16, #tpu.memory_space<vmem>>, vector<1x1x8x4xbf16>
    %70 = vector.shape_cast %69 : vector<1x1x8x4xbf16> to vector<8x4xbf16>
    %cst_77 = arith.constant dense<0.000000e+00> : vector<8x256xf32>
    %71 = tpu.matmul %70, %68, %cst_77 {dimension_numbers = #tpu.dot_dimension_numbers<[1], [1], [0], [0], [0, 0, 1, 0], [], []>} : vector<8x4xbf16>, vector<256x4xbf16>, vector<8x256xf32> -> vector<8x256xf32>
    %72 = arith.addf %64, %71 : vector<8x256xf32>
    %c0_78 = arith.constant 0 : index
    %c0_79 = arith.constant 0 : index
    %c0_80 = arith.constant 0 : index
    %73 = vector.load %arg4[%c0_78, %c0_79, %c0_80] : memref<1x8x256xf32, #tpu.memory_space<vmem>>, vector<1x8x256xf32>
    %74 = vector.shape_cast %73 : vector<1x8x256xf32> to vector<8x256xf32>
    %75 = vector.shape_cast %72 : vector<8x256xf32> to vector<1x8x256xf32>
    tpu.vector_store %arg4[%c0_78, %c0_79, %c0_80], %75 {strides = array<i32>} : memref<1x8x256xf32, #tpu.memory_space<vmem>>, vector<1x8x256xf32>,
    %cst_81 = arith.constant dense<0.000000e+00> : vector<8xf32>
    %76 = vector.multi_reduction <add>, %72, %cst_81 [1] : vector<8x256xf32> to vector<8xf32>
    %77 = vector.shape_cast %76 : vector<8xf32> to vector<8x1xf32>
    %c0_82 = arith.constant 0 : index
    %c0_83 = arith.constant 0 : index
    %c0_84 = arith.constant 0 : index
    %78 = vector.load %arg5[%c0_82, %c0_83, %c0_84] : memref<1x8x1xf32, #tpu.memory_space<vmem>>, vector<1x8x1xf32>
    %79 = vector.shape_cast %78 : vector<1x8x1xf32> to vector<8x1xf32>
    %80 = vector.shape_cast %77 : vector<8x1xf32> to vector<1x8x1xf32>
    tpu.vector_store %arg5[%c0_82, %c0_83, %c0_84], %80 {strides = array<i32>} : memref<1x8x1xf32, #tpu.memory_space<vmem>>, vector<1x8x1xf32>,
    %81 = arith.mulf %72, %72 : vector<8x256xf32>
    %cst_85 = arith.constant dense<0.000000e+00> : vector<8xf32>
    %82 = vector.multi_reduction <add>, %81, %cst_85 [1] : vector<8x256xf32> to vector<8xf32>
    %83 = vector.shape_cast %82 : vector<8xf32> to vector<8x1xf32>
    %c0_86 = arith.constant 0 : index
    %c0_87 = arith.constant 0 : index
    %c0_88 = arith.constant 0 : index
    %84 = vector.load %arg6[%c0_86, %c0_87, %c0_88] : memref<1x8x1xf32, #tpu.memory_space<vmem>>, vector<1x8x1xf32>
    %85 = vector.shape_cast %84 : vector<1x8x1xf32> to vector<8x1xf32>
    %86 = vector.shape_cast %83 : vector<8x1xf32> to vector<1x8x1xf32>
    tpu.vector_store %arg6[%c0_86, %c0_87, %c0_88], %86 {strides = array<i32>} : memref<1x8x1xf32, #tpu.memory_space<vmem>>, vector<1x8x1xf32>,
    return
  }
  func.func @transform_0(%arg0: i32, %arg1: i32) -> (i32, i32, i32, i32) {
    %c0_i32 = arith.constant 0 : i32
    %c0_i32_0 = arith.constant 0 : i32
    %c0_i32_1 = arith.constant 0 : i32
    %c0_i32_2 = arith.constant 0 : i32
    return %c0_i32, %c0_i32_0, %arg1, %c0_i32_1 : i32, i32, i32, i32
  }
  func.func @transform_1(%arg0: i32, %arg1: i32) -> (i32, i32, i32, i32) {
    %c0_i32 = arith.constant 0 : i32
    %c0_i32_0 = arith.constant 0 : i32
    %c0_i32_1 = arith.constant 0 : i32
    %c0_i32_2 = arith.constant 0 : i32
    return %arg0, %c0_i32, %c0_i32_0, %c0_i32_1 : i32, i32, i32, i32
  }
  func.func @transform_2(%arg0: i32, %arg1: i32) -> (i32, i32, i32) {
    %c0_i32 = arith.constant 0 : i32
    %c0_i32_0 = arith.constant 0 : i32
    return %arg0, %arg1, %c0_i32 : i32, i32, i32
  }
  func.func @transform_3(%arg0: i32, %arg1: i32) -> (i32, i32, i32) {
    %c0_i32 = arith.constant 0 : i32
    %c0_i32_0 = arith.constant 0 : i32
    return %arg0, %arg1, %c0_i32 : i32, i32, i32
  }
  func.func @transform_4(%arg0: i32, %arg1: i32) -> (i32, i32, i32) {
    %c0_i32 = arith.constant 0 : i32
    %c0_i32_0 = arith.constant 0 : i32
    return %arg0, %arg1, %c0_i32 : i32, i32, i32
  }
}

</mosaic_0001>

<bundles_post_ra>
// kernel: tpu_custom_call.1
= control target key start
LH: loop header
LB: loop body
LE: loop exit
PB: predicated region body
PF: predicated region fallthrough
CT: control target
= control target key end

     0   :  { %10 = vsyncpa [#allocation3], 0  ;;  %s3362_s0 = inlined_call_operand.hbm [shape: bf16[3,3,8,4], index: 0, kind: input, shape index: {}]   ;;  %s3363_s1 = inlined_call_operand.hbm [shape: f32[2,18,18,4], index: 1, kind: input, shape index: {}]   ;;  %s3364_s2 = inlined_call_operand.hbm [shape: f32[2,8,256], index: 2, kind: output, shape index: {0}]   ;;  %s3365_s3 = inlined_call_operand.hbm [shape: f32[2,8,1], index: 3, kind: output, shape index: {1}]   ;;  %s3366_s4 = inlined_call_operand.hbm [shape: f32[2,8,1], index: 4, kind: output, shape index: {2}]  }
   0x1   :  { %11 = vsyncpa [#allocation6], 0 }
   0x2   :  { %13 = vsyncpa [#allocation6 + $0x1], 0 }
   0x3   :  { %14 = vsyncpa [#allocation4], 0 }
   0x4   :  { %16 = vsyncpa [#allocation4 + $0x1], 0 }
   0x5   :  { %17 = vsyncpa [#allocation9], 0 }
   0x6   :  { %19 = vsyncpa [#allocation9 + $0x1], 0  ;;  %s2611_s15 = smov 0   ;;  %s2613_s16 = smov 0  }
   0x7   :  { %s2615_s17 = smov 0   ;;  %s2617_s18 = smov 0  }
   0x8   :  { %s2619_s19 = smov 0   ;;  %s2621_s20 = smov 0  }
   0x9 LB: > { %s2642_s21 = sadd.s32 4294967295, %s2575_s20   ;;  %s1796_s22 = sadd.s32 4294967294, %s2575_s20   ;;  %s2575_s20 = sphi %s2621_s20, %s25_s20   ;;  %s2571_s19 = sphi %s2619_s19, %s3387_s19   ;;  %s2567_s18 = sphi %s2617_s18, %s3386_s18   ;;  %s2563_s17 = sphi %s2615_s17, %s3385_s17   ;;  %s2559_s16 = sphi %s2613_s16, %s3384_s16   ;;  %s2555_s15 = sphi %s2611_s15, %s3383_s15  }
   0xa   : > { %p83_p0 = scmp.ne.s32.totalorder %s2559_s16, %s2555_s15  ;;  %p3367_p1 = scmp.eq.s32.totalorder %s2642_s21, 0 }
   0xb   : > { %p115_p3 = scmp.eq.s32.totalorder %s1796_s22, 1  ;;  %p1797_p5 = scmp.ge.s32.totalorder %s2575_s20, 1 }
   0xc   : > { %p2653_p4 = por %p3367_p1, %p83_p0  ;;  %p178_p7 = scmp.lt.s32.totalorder %s2575_s20, 3 }
   0xd   : > { %p2658_p6 = por %p115_p3, %p83_p0  ;;  %s2577_s26 = smov [#allocation2]  }
   0xe   : > { %s3370_s23 = scalar_select %p2653_p4, 1, 0 }
   0xf   : > { %s3371_s24 = scalar_select %p2658_p6, 1, 0 }
  0x10   : > { %p2663_p8 = pnand %p1797_p5, %p178_p7  ;;  %s192_s27 = sshll.u32 %s2577_s26, 4  ;;  %s193_s27 = int_to_ptr.vmem [resolvable:$true] %s192_s27 }
  0x11   : > { %s37_s29 = sadd.s32 1, %s2571_s19  ;;  %s2371_s6 = scalar_lea.hbm %s3362_s0, 576 }
  0x12   : > { %s3372_s25 = scalar_select %p2663_p8, 1, 0 }
  0x13   : > { %p2296_p9 = pneg %p2663_p8  ;;  %p2372_p12 = scmp.ne.s32.totalorder %s3362_s0, %s2371_s6 }
  0x14   : > { %p2378_p5 = scmp.lt.u32.totalorder %s2371_s6, %s3362_s0 }
  0x15   : > { %p2672_p11 = pnand %p2296_p9, %p3367_p1 }
  0x17   : > { %p2373_p13 = pneg %p2672_p11 }
  0x19   : > { %p2374_p0 = pnand %p2373_p13, %p2372_p12 }
  0x1b   : > { %p2375_p3 = pneg %p2374_p0 }
  0x1d   : > { %p2380_p7 = pnand %p2378_p5, %p2375_p3 }
  0x1f   : > { %2383 = shalt.err (!%p2380_p7)
}
  0x20   : > { %s2384_s11 = scalar_lea.vmem %s193_s27, 576  ;;  %p2392_p2 = scmp.lt.s32.totalorder %s193_s27, %s193_s27 }
  0x21   : > { %p2385_p9 = scmp.ne.s32.totalorder %s193_s27, %s2384_s11  ;;  %p2393_p6 = scmp.lt.s32.totalorder %s2384_s11, %s2384_s11 }
  0x23   : > { %p2387_p10 = pnand %p2385_p9, %p2373_p13  ;;  %p2394_p4 = por %p2393_p6, %p2392_p2 }
  0x25   : > { %p2388_p1 = pneg %p2387_p10 }
  0x27   : > { %p2395_p8 = pnand %p2394_p4, %p2388_p1 }
  0x29   : > { %2398 = shalt.err (!%p2395_p8)
}
  0x2a   : > { %s2578_s12 = smov 64   ;;  %s2579_s13 = smov 4  }
  0x2b   : > { %2299 = dma.hbm_to_vmem [thread:$0]  (!%p2672_p11), %s3362_s0, 576, %s193_s27, [#allocation3], %s2578_s12, %s2578_s12, %s2579_s13  }
  0x2c   : > { %p39_p1 = scmp.ge.s32.totalorder %s37_s29, 2  ;;  %s70_s30 = sadd.s32 1, %s2563_s17 }
  0x2d   : > { %p77_p2 = scmp.ne.s32.totalorder %s2563_s17, %s2559_s16  ;;  %p78_p4 = scmp.eq.s32.totalorder %s2575_s20, 0 }
  0x2e   : > { %s3389_s29 = smov (%p39_p1, %s37_s29), 0  ;;  %p3374_p8 = scmp.eq.s32.totalorder %s2642_s21, 1 }
  0x2f   : > { %p79_p6 = por %p78_p4, %p77_p2  ;;  %s67_s6 = ssub.s32 %s2571_s19, %s3389_s29 }
  0x30   : > { %p2701_p10 = por %p3374_p8, %p77_p2  ;;  %p2315_p12 = scmp.lt.s32.totalorder %s2575_s20, 2 }
  0x31   : > { %p68_p13 = scmp.eq.s32.totalorder %s67_s6, 0  ;;  %s206_s28 = sand.u32 1, %s2563_s17  }
  0x32   : > { %s2281_s7 = smul.u32 432, %s206_s28  ;;  %p2713_p11 = pnand %p2315_p12, %p79_p6 }
  0x33   : > { %s2710_s8 = scalar_select %p68_p13, %s2563_s17, %s70_s30  }
  0x34   : > { %s2282_s27 = smul.u32 6912, %s2571_s19  ;;  %s210_s9 = scalar_lea.vmem [#allocation5], %s2281_s7 }
  0x35   : > { %s217_s10 = sshll.u32 %s210_s9, 4  ;;  %s2724_s26 = scalar_lea.sflag [#allocation6], %s206_s28  ;;  %s2722_s10 = int_to_ptr.vmem [resolvable:$true] %s217_s10 }
  0x36   : > { %s2720_s14 = scalar_lea.hbm %s3363_s1, %s2282_s27  ;;  %p2401_p3 = pneg %p2713_p11 }
  0x37   : > { %s2399_s30 = scalar_lea.hbm %s2720_s14, 6912  ;;  %s2404_s27 = scalar_lea.hbm %s3363_s1, 13824 }
  0x38   : > { %p2400_p0 = scmp.ne.s32.totalorder %s2720_s14, %s2399_s30  ;;  %p2405_p9 = scmp.lt.u32.totalorder %s2720_s14, %s3363_s1 }
  0x39   : > { %p2406_p1 = scmp.lt.u32.totalorder %s2404_s27, %s2399_s30  ;;  %p2408_p4 = scmp.lt.u32.totalorder %s2399_s30, %s2720_s14 }
  0x3a   : > { %p2402_p5 = pnand %p2401_p3, %p2400_p0 }
  0x3b   : > { %p2407_p2 = por %p2406_p1, %p2405_p9 }
  0x3c   : > { %p2403_p7 = pneg %p2402_p5 }
  0x3d   : > { %p2409_p6 = por %p2408_p4, %p2407_p2 }
  0x3f   : > { %p2410_p8 = pnand %p2409_p6, %p2403_p7 }
  0x41   : > { %2413 = shalt.err (!%p2410_p8)
}
  0x42   : > { %s2414_s28 = scalar_lea.vmem %s2722_s10, 6912  ;;  %s2580_s13 = smov [#allocation5]  }
  0x43   : > { %p2415_p12 = scmp.ne.s32.totalorder %s2722_s10, %s2414_s28  ;;  %s2419_s6 = sshll.u32 %s2580_s13, 4  ;;  %s2420_s6 = int_to_ptr.vmem [resolvable:$false] %s2419_s6 }
  0x44   : > { %s2421_s7 = scalar_lea.vmem %s2420_s6, 13824  ;;  %p2422_p5 = scmp.lt.s32.totalorder %s2722_s10, %s2420_s6 }
  0x45   : > { %p2417_p13 = pnand %p2415_p12, %p2401_p3  ;;  %p2423_p9 = scmp.lt.s32.totalorder %s2421_s7, %s2414_s28 }
  0x47   : > { %p2418_p0 = pneg %p2417_p13  ;;  %p2424_p1 = por %p2423_p9, %p2422_p5 }
  0x49   : > { %p2425_p2 = pnand %p2424_p1, %p2418_p0 }
  0x4b   : > { %2428 = shalt.err (!%p2425_p2)
}
  0x4c   : > { %s2581_s30 = smov 128   ;;  %s2582_s27 = smov 8  }
  0x4d   : > { %2303 = dma.hbm_to_vmem [thread:$0]  (!%p2713_p11), %s2720_s14, 6912, %s2722_s10, %s2724_s26, %s2581_s30, %s2581_s30, %s2582_s27  }
  0x4e   : > { %p3377_p3 = scmp.ne.s32.totalorder %s3372_s25, 0 }
  0x4f   : > { %p3378_p7 = scmp.eq.s32.totalorder (!%p3377_p3), %s2642_s21, 0 }
  0x50   : > { %229 = sbr.rel (%p3377_p3) target bundleno = 815 (0x32f), region = 28 }
  0x57   : > { %2538 = dma.done.wait (%p3378_p7), [#allocation3], 576   ;;  %p3379_p4 = pmov %p3378_p7 }
  0x58   : > { %s2759_s9 = sand.u32 1, %s2559_s16   ;;  %p3380_p11 = scmp.ne.s32.totalorder %s3370_s23, 0 }
  0x59   : > { %2540 = vsyncadd (%p3379_p4), [#allocation3], 4294966720  ;;  %s2283_s12 = smul.u32 432, %s2759_s9  ;;  %s236_s28 = scalar_lea.sflag [#allocation6], %s2759_s9 }
  0x5b   : > { %s2763_s13 = scalar_lea.vmem [#allocation5], %s2283_s12 }
  0x5c   : > { %2542 = dma.done.wait (%p3380_p11), %s236_s28, 6912  }
  0x5d   : > { %2544 = vsyncadd (%p3380_p11), %s236_s28, 4294960384  ;;  %v340_v0 = vld [vmem:[%s2763_s13 + $0xc1] sm:$0xff]  ;;  %v341_v1 = vld [vmem:[%s2763_s13 + $0xc9] sm:$0xff]  ;;  %vm374_vm0 = vcmask 31744   ;;  %s1803_s23 = sshll.u32 %s2759_s9, 4  ;;  %s2016_s10 = sshll.u32 %s2567_s18, 8 }
  0x5e   : > { %v1858_v2 = vld [vmem:[%s2763_s13 + $0xd9] sm:$0xff]  ;;  %v2772_v3 = vpack.c.bf16 %v341_v1, %v340_v0  ;;  %v1859_v4 = vld [vmem:[%s2763_s13 + $0xe1] sm:$0xff]  ;;  %v325_v6 = vld [vmem:[%s2763_s13 + $0x9] sm:$0xff]  ;;  %s259_s25 = scalar_lea.vmem [#allocation7], %s1803_s23  ;;  %s3242_s6 = scalar_lea.hbm %s3364_s2, %s2016_s10 }
  0x5f   : > { %v324_v5 = vld [vmem:[%s2763_s13 + $0x1] sm:$0xff]  ;;  %v888_v7 = vpack.c.bf16 %v1859_v4, %v1858_v2  ;;  %v1842_v9 = vld [vmem:[%s2763_s13 + $0x19] sm:$0xff]  ;;  %v1860_v11 = vld [vmem:[%s2763_s13 + $0xf1] sm:$0xff]  ;;  %s1609_s11 = sshll.u32 %s259_s25, 4  ;;  %s1583_s7 = scalar_lea.sflag [#allocation4], %s2759_s9  ;;  %s1610_s11 = int_to_ptr.vmem [resolvable:$true] %s1609_s11 }
  0x60   : > { %v356_v8 = vpack.c.bf16 %v325_v6, %v324_v5  ;;  %v1843_v10 = vld [vmem:[%s2763_s13 + $0x21] sm:$0xff]  ;;  %2209 = vmatprep.subr.msk.bf16.mxu1 %vm374_vm0, %v2772_v3  ;;  %v1861_v13 = vld [vmem:[%s2763_s13 + $0xf9] sm:$0xff]  ;;  %v1844_v16 = vld [vmem:[%s2763_s13 + $0x31] sm:$0xff]  ;;  %v923_v2 = vsel %vm374_vm0, %v2772_v3, 0  ;;  %s2429_s30 = scalar_lea.vmem %s1610_s11, 256  ;;  %s2583_s27 = smov [#allocation7]  }
  0x61   : > { %v880_v12 = vpack.c.bf16 %v1843_v10, %v1842_v9  ;;  %2241 = vmatprep.subr.msk.bf16.mxu0 %vm374_vm0, %v888_v7  ;;  %v2785_v15 = vpack.c.bf16 %v1861_v13, %v1860_v11  ;;  %v1845_v17 = vld [vmem:[%s2763_s13 + $0x39] sm:$0xff]  ;;  %v1862_v20 = vld [vmem:[%s2763_s13 + $0x109] sm:$0xff]  ;;  %v1863_v21 = vld [vmem:[%s2763_s13 + $0x111] sm:$0xff]  ;;  %p2430_p6 = scmp.ne.s32.totalorder %s1610_s11, %s2429_s30  ;;  %s2433_s12 = sshll.u32 %s2583_s27, 4  ;;  %s2434_s12 = int_to_ptr.vmem [resolvable:$false] %s2433_s12 }
  0x62   : > { %v379_v14 = vsel %vm374_vm0, %v356_v8, 0  ;;  %v881_v19 = vpack.c.bf16 %v1845_v17, %v1844_v16  ;;  %v2798_v23 = vpack.c.bf16 %v1863_v21, %v1862_v20  ;;  %v2800_v24 = vld [vmem:[#allocation2 + $0x4] sm:$0xf]  ;;  %v2806_v27 = vld [vmem:[#allocation2 + $0x10] sm:$0xf]  ;;  %s2435_s28 = scalar_lea.vmem %s2434_s12, 512  ;;  %p2436_p13 = scmp.lt.s32.totalorder %s1610_s11, %s2434_s12 }
  0x63   : > { %2018 = vmatpush3.bf16.xpose.msra.mxu1 %v379_v14  ;;  %v902_v18 = vsel %vm374_vm0, %v880_v12, 0  ;;  %v1846_v25 = vld [vmem:[%s2763_s13 + $0x49] sm:$0xff]  ;;  %v1847_v26 = vld [vmem:[%s2763_s13 + $0x51] sm:$0xff]  ;;  %2033 = vmatprep.mubr.msk.bf16.mxu1 %vm374_vm0, %v2800_v24  ;;  %v1864_v29 = vld [vmem:[%s2763_s13 + $0x121] sm:$0xff]  ;;  %p2431_p8 = pnand %p2430_p6, %p2701_p10  ;;  %p2437_p0 = scmp.lt.s32.totalorder %s2435_s28, %s2429_s30 }
  0x64   : > { %2090 = vmatpush3.bf16.xpose.msra.mxu0 %v902_v18  ;;  %2210 = vmatprep.subr.msk.bf16.mxu1 %vm374_vm0, %v888_v7  ;;  %v2796_v22 = vsel %vm374_vm0, %v881_v19, 0  ;;  %v882_v28 = vpack.c.bf16 %v1847_v26, %v1846_v25  ;;  %v1865_v30 = vld [vmem:[%s2763_s13 + $0x129] sm:$0xff]  ;;  %v1848_v33 = vld [vmem:[%s2763_s13 + $0x61] sm:$0xff]  ;;  %v1866_v36 = vld [vmem:[%s2763_s13 + $0x139] sm:$0xff] }
  0x65   : > { %2242 = vmatprep.subr.msk.bf16.mxu0 %vm374_vm0, %v2785_v15  ;;  %2105 = vmatprep.mubr.msk.bf16.mxu0 %vm374_vm0, %v2806_v27  ;;  %v2820_v32 = vpack.c.bf16 %v1865_v30, %v1864_v29  ;;  %v1849_v34 = vld [vmem:[%s2763_s13 + $0x69] sm:$0xff]  ;;  %v1867_v37 = vld [vmem:[%s2763_s13 + $0x141] sm:$0xff]  ;;  %v1850_v40 = vld [vmem:[%s2763_s13 + $0x79] sm:$0xff]  ;;  %p2432_p12 = pneg %p2431_p8  ;;  %p2438_p5 = por %p2437_p0, %p2436_p13 }
  0x66   : > { %v2818_v31 = vsel %vm374_vm0, %v882_v28, 0  ;;  %v883_v35 = vpack.c.bf16 %v1849_v34, %v1848_v33  ;;  %v2835_v39 = vpack.c.bf16 %v1867_v37, %v1866_v36  ;;  %v1851_v41 = vld [vmem:[%s2763_s13 + $0x81] sm:$0xff]  ;;  %v1868_v43 = vld [vmem:[%s2763_s13 + $0x151] sm:$0xff]  ;;  %v1869_v44 = vld [vmem:[%s2763_s13 + $0x159] sm:$0xff] }
  0x67   : > { %v884_v42 = vpack.c.bf16 %v1851_v41, %v1850_v40  ;;  %v2850_v46 = vpack.c.bf16 %v1869_v44, %v1868_v43  ;;  %v1852_v47 = vld [vmem:[%s2763_s13 + $0x91] sm:$0xff]  ;;  %v1853_v48 = vld [vmem:[%s2763_s13 + $0x99] sm:$0xff]  ;;  %v1870_v50 = vld [vmem:[%s2763_s13 + $0x169] sm:$0xff]  ;;  %p2439_p9 = pnand %p2438_p5, %p2432_p12 }
  0x68   : > { %v2833_v38 = vsel %vm374_vm0, %v883_v35, 0  ;;  %v885_v49 = vpack.c.bf16 %v1853_v48, %v1852_v47  ;;  %v1871_v51 = vld [vmem:[%s2763_s13 + $0x171] sm:$0xff]  ;;  %v1854_v54 = vld [vmem:[%s2763_s13 + $0xa9] sm:$0xff]  ;;  %v1872_v57 = vld [vmem:[%s2763_s13 + $0x181] sm:$0xff] }
  0x69   : > { %v2848_v45 = vsel %vm374_vm0, %v884_v42, 0  ;;  %v2865_v53 = vpack.c.bf16 %v1871_v51, %v1870_v50  ;;  %v1855_v55 = vld [vmem:[%s2763_s13 + $0xb1] sm:$0xff]  ;;  %v1873_v58 = vld [vmem:[%s2763_s13 + $0x189] sm:$0xff]  ;;  %v291_v61 = vld [vmem:[%s2763_s13 + $0xc0] sm:$0xff] }
  0x6a   : > { %v2863_v52 = vsel %vm374_vm0, %v885_v49, 0  ;;  %v886_v56 = vpack.c.bf16 %v1855_v55, %v1854_v54  ;;  %v2880_v60 = vpack.c.bf16 %v1873_v58, %v1872_v57  ;;  %v292_v62 = vld [vmem:[%s2763_s13 + $0xc8] sm:$0xff]  ;;  %v1891_v63 = vld [vmem:[%s2763_s13 + $0xda] sm:$0xff]  ;;  %v1893_v12 = vld [vmem:[%s2763_s13 + $0xf2] sm:$0xff] }
  0x6b   : > { %2020 = vmatpush3.bf16.xpose.msra.mxu1 %v902_v18  ;;  %v1892_v0 = vld [vmem:[%s2763_s13 + $0xe2] sm:$0xff]  ;;  %v2892_v1 = vpack.c.bf16 %v292_v62, %v291_v61  ;;  %v1875_v7 = vld [vmem:[%s2763_s13 + $0x1a] sm:$0xff]  ;;  %v1877_v21 = vld [vmem:[%s2763_s13 + $0x32] sm:$0xff] }
  0x6c   : > { %2092 = vmatpush3.bf16.xpose.msra.mxu0 %v2796_v22  ;;  %2211 = vmatprep.subr.msk.bf16.mxu1 %vm374_vm0, %v2785_v15  ;;  %v2878_v59 = vsel %vm374_vm0, %v886_v56, 0  ;;  %v2896_v4 = vpack.c.bf16 %v1892_v0, %v1891_v63  ;;  %v275_v5 = vld [vmem:[%s2763_s13] sm:$0xff]  ;;  %v276_v6 = vld [vmem:[%s2763_s13 + $0x8] sm:$0xff]  ;;  %v293_v10 = vld [vmem:[%s2763_s13 + $0xd8] sm:$0xff] }
  0x6d   : > { %2243 = vmatprep.subr.msk.bf16.mxu0 %vm374_vm0, %v2798_v23  ;;  %v1876_v8 = vld [vmem:[%s2763_s13 + $0x22] sm:$0xff]  ;;  %v307_v9 = vpack.c.bf16 %v276_v6, %v275_v5  ;;  %v1894_v13 = vld [vmem:[%s2763_s13 + $0xfa] sm:$0xff]  ;;  %v295_v30 = vld [vmem:[%s2763_s13 + $0xf0] sm:$0xff] }
  0x6e   : > { %v1024_v3 = vpack.c.bf16 %v1876_v8, %v1875_v7  ;;  %v294_v11 = vld [vmem:[%s2763_s13 + $0xe0] sm:$0xff]  ;;  %v2917_v18 = vpack.c.bf16 %v1894_v13, %v1893_v12  ;;  %v277_v19 = vld [vmem:[%s2763_s13 + $0x18] sm:$0xff]  ;;  %v279_v41 = vld [vmem:[%s2763_s13 + $0x30] sm:$0xff] }
  0x6f   : > { %v471_v14 = vsel %vm374_vm0, %v307_v9, 0  ;;  %v2912_v16 = vpack.c.bf16 %v294_v11, %v293_v10  ;;  %v278_v20 = vld [vmem:[%s2763_s13 + $0x20] sm:$0xff]  ;;  %v2925_v26 = vld [vmem:[#allocation2] sm:$0xf]  ;;  %v1896_v34 = vld [vmem:[%s2763_s13 + $0x112] sm:$0xff] }
  0x70   : > { %v2915_v17 = vsel %vm374_vm0, %v1024_v3, 0  ;;  %v1878_v25 = vld [vmem:[%s2763_s13 + $0x3a] sm:$0xff]  ;;  %v1879_v43 = vld [vmem:[%s2763_s13 + $0x4a] sm:$0xff]  ;;  %v1880_v44 = vld [vmem:[%s2763_s13 + $0x52] sm:$0xff] }
  0x71   : > { %v2929_v28 = vld [vmem:[#allocation2 + $0x14] sm:$0xf]  ;;  %v1025_v29 = vpack.c.bf16 %v1878_v25, %v1877_v21  ;;  %v296_v33 = vld [vmem:[%s2763_s13 + $0xf8] sm:$0xff]  ;;  %v1026_v48 = vpack.c.bf16 %v1880_v44, %v1879_v43  ;;  %v297_v49 = vld [vmem:[%s2763_s13 + $0x108] sm:$0xff] }
  0x72   : > { %v2947_v36 = vpack.c.bf16 %v296_v33, %v295_v30  ;;  %v280_v42 = vld [vmem:[%s2763_s13 + $0x38] sm:$0xff]  ;;  %v298_v50 = vld [vmem:[%s2763_s13 + $0x110] sm:$0xff]  ;;  %v1897_v51 = vld [vmem:[%s2763_s13 + $0x122] sm:$0xff] }
  0x73   : > { %2022 = vmatpush3.bf16.xpose.msra.mxu1 %v2796_v22  ;;  %v2950_v37 = vsel %vm374_vm0, %v1025_v29, 0  ;;  %v309_v47 = vpack.c.bf16 %v280_v42, %v279_v41  ;;  %v1898_v54 = vld [vmem:[%s2763_s13 + $0x12a] sm:$0xff]  ;;  %v2971_v56 = vpack.c.bf16 %v298_v50, %v297_v49  ;;  %v2974_v57 = vsel %vm374_vm0, %v1026_v48, 0  ;;  %v1881_v63 = vld [vmem:[%s2763_s13 + $0x62] sm:$0xff]  ;;  %v1899_v8 = vld [vmem:[%s2763_s13 + $0x13a] sm:$0xff] }
  0x74   : > { %2094 = vmatpush3.bf16.xpose.msra.mxu0 %v2818_v31  ;;  %2212 = vmatprep.subr.msk.bf16.mxu1 %vm374_vm0, %v2798_v23  ;;  %v2976_v58 = vpack.c.bf16 %v1898_v54, %v1897_v51  ;;  %v281_v61 = vld [vmem:[%s2763_s13 + $0x48] sm:$0xff]  ;;  %v282_v62 = vld [vmem:[%s2763_s13 + $0x50] sm:$0xff]  ;;  %v299_v6 = vld [vmem:[%s2763_s13 + $0x120] sm:$0xff] }
  0x75   : > { %2244 = vmatprep.subr.msk.bf16.mxu0 %vm374_vm0, %v2820_v32  ;;  %v2969_v55 = vsel %vm374_vm0, %v309_v47, 0  ;;  %v1882_v0 = vld [vmem:[%s2763_s13 + $0x6a] sm:$0xff]  ;;  %v1900_v9 = vld [vmem:[%s2763_s13 + $0x142] sm:$0xff]  ;;  %v1901_v30 = vld [vmem:[%s2763_s13 + $0x152] sm:$0xff] }
  0x76   : > { %v1027_v5 = vpack.c.bf16 %v1882_v0, %v1881_v63  ;;  %v300_v7 = vld [vmem:[%s2763_s13 + $0x128] sm:$0xff]  ;;  %v3000_v12 = vpack.c.bf16 %v1900_v9, %v1899_v8  ;;  %v283_v13 = vld [vmem:[%s2763_s13 + $0x60] sm:$0xff]  ;;  %v285_v43 = vld [vmem:[%s2763_s13 + $0x78] sm:$0xff] }
  0x77   : > { %v2995_v10 = vpack.c.bf16 %v300_v7, %v299_v6  ;;  %v302_v29 = vld [vmem:[%s2763_s13 + $0x140] sm:$0xff]  ;;  %v1885_v47 = vld [vmem:[%s2763_s13 + $0x92] sm:$0xff]  ;;  %v1887_v8 = vld [vmem:[%s2763_s13 + $0xaa] sm:$0xff] }
  0x78   : > { %v2998_v11 = vsel %vm374_vm0, %v1027_v5, 0  ;;  %v1902_v33 = vld [vmem:[%s2763_s13 + $0x15a] sm:$0xff]  ;;  %v303_v51 = vld [vmem:[%s2763_s13 + $0x150] sm:$0xff] }
  0x79   : > { %v3024_v42 = vpack.c.bf16 %v1902_v33, %v1901_v30  ;;  %v286_v44 = vld [vmem:[%s2763_s13 + $0x80] sm:$0xff]  ;;  %v304_v54 = vld [vmem:[%s2763_s13 + $0x158] sm:$0xff]  ;;  %v287_v6 = vld [vmem:[%s2763_s13 + $0x90] sm:$0xff] }
  0x7a   : > { %v1886_v48 = vld [vmem:[%s2763_s13 + $0x9a] sm:$0xff]  ;;  %v312_v49 = vpack.c.bf16 %v286_v44, %v285_v43  ;;  %v3043_v0 = vpack.c.bf16 %v304_v54, %v303_v51  ;;  %v1888_v9 = vld [vmem:[%s2763_s13 + $0xb2] sm:$0xff]  ;;  %v289_v43 = vld [vmem:[%s2763_s13 + $0xa8] sm:$0xff] }
  0x7b   : > { %2024 = vmatpush3.bf16.xpose.msra.mxu1 %v2818_v31  ;;  %v1029_v50 = vpack.c.bf16 %v1886_v48, %v1885_v47  ;;  %v288_v7 = vld [vmem:[%s2763_s13 + $0x98] sm:$0xff]  ;;  %v290_v44 = vld [vmem:[%s2763_s13 + $0xb0] sm:$0xff]  ;;  %v1889_v47 = vld [vmem:[%s2763_s13 + $0xc2] sm:$0xff] }
  0x7c   : > { %2096 = vmatpush3.bf16.xpose.msra.mxu0 %v2833_v38  ;;  %2213 = vmatprep.subr.msk.bf16.mxu1 %vm374_vm0, %v2820_v32  ;;  %v3041_v63 = vsel %vm374_vm0, %v312_v49, 0  ;;  %v1890_v48 = vld [vmem:[%s2763_s13 + $0xca] sm:$0xff]  ;;  %v314_v49 = vpack.c.bf16 %v290_v44, %v289_v43 }
  0x7d   : > { %2245 = vmatprep.subr.msk.bf16.mxu0 %vm374_vm0, %v2835_v39 }
  0x7e   : > { %v3085_v51 = vsel %vm374_vm0, %v314_v49, 0 }
  0x83   : > { %2026 = vmatpush3.bf16.xpose.msra.mxu1 %v2833_v38 }
  0x84   : > { %2098 = vmatpush3.bf16.xpose.msra.mxu0 %v2848_v45  ;;  %2214 = vmatprep.subr.msk.bf16.mxu1 %vm374_vm0, %v2835_v39 }
  0x85   : > { %2246 = vmatprep.subr.msk.bf16.mxu0 %vm374_vm0, %v2850_v46 }
  0x8b   : > { %2028 = vmatpush3.bf16.xpose.msra.mxu1 %v2848_v45 }
  0x8c   : > { %2100 = vmatpush3.bf16.xpose.msra.mxu0 %v2863_v52  ;;  %2215 = vmatprep.subr.msk.bf16.mxu1 %vm374_vm0, %v2850_v46 }
  0x8d   : > { %2247 = vmatprep.subr.msk.bf16.mxu0 %vm374_vm0, %v2865_v53 }
  0x93   : > { %2030 = vmatpush3.bf16.xpose.msra.mxu1 %v2863_v52 }
  0x94   : > { %2102 = vmatpush3.bf16.xpose.msra.mxu0 %v2878_v59  ;;  %2216 = vmatprep.subr.msk.bf16.mxu1 %vm374_vm0, %v2865_v53 }
  0x95   : > { %2248 = vmatprep.subr.msk.bf16.mxu0 %vm374_vm0, %v2880_v60 }
  0x9b   : > { %2032 = vmatpush3.bf16.xpose.msra.mxu1 %v2878_v59 }
  0x9c   : > { %2104 = vmatpush3.bf16.xpose.msra.mxu0 %v923_v2  ;;  %2217 = vmatprep.subr.msk.bf16.mxu1 %vm374_vm0, %v2892_v1  ;;  %v310_v2 = vpack.c.bf16 %v282_v62, %v281_v61  ;;  %v1903_v61 = vld [vmem:[%s2763_s13 + $0x16a] sm:$0xff]  ;;  %v1904_v62 = vld [vmem:[%s2763_s13 + $0x172] sm:$0xff] }
  0x9d   : > { %2249 = vmatprep.subr.msk.bf16.mxu0 %vm374_vm0, %v2896_v4  ;;  %v3048_v5 = vpack.c.bf16 %v1904_v62, %v1903_v61  ;;  %v559_v61 = vld [vmem:[%s2763_s13 + $0x2] sm:$0xff]  ;;  %v560_v62 = vld [vmem:[%s2763_s13 + $0xa] sm:$0xff] }
  0x9e   : > { %v2993_v3 = vsel %vm374_vm0, %v310_v2, 0  ;;  %v3046_v2 = vsel %vm374_vm0, %v1029_v50, 0  ;;  %v1031_v50 = vpack.c.bf16 %v1890_v48, %v1889_v47 }
  0xa0   : > { %v3088_v54 = vsel %vm374_vm0, %v1031_v50, 0 }
  0xa2   : > { %2034 = vmatmul.mubr.msk.bf16.vlgmr.msra.gmra.mrb[0].mxu1 %vm374_vm0, %v2800_v24  ;;  %v308_v24 = vpack.c.bf16 %v278_v20, %v277_v19  ;;  %v1883_v19 = vld [vmem:[%s2763_s13 + $0x7a] sm:$0xff]  ;;  %v1884_v20 = vld [vmem:[%s2763_s13 + $0x82] sm:$0xff] }
  0xa3   : > { %2036 = vmatpush3.bf16.xpose.msra.mxu1 %v471_v14  ;;  %2106 = vmatmul.mubr.msk.bf16.vlgmr.msra.gmra.mrb[0].mxu0 %vm374_vm0, %v2806_v27  ;;  %v1895_v27 = vld [vmem:[%s2763_s13 + $0x10a] sm:$0xff]  ;;  %v1028_v25 = vpack.c.bf16 %v1884_v20, %v1883_v19 }
  0xa4   : > { %2108 = vmatpush3.bf16.xpose.msra.mxu0 %v2915_v17  ;;  %2218 = vmatprep.subr.msk.bf16.mxu1 %vm374_vm0, %v2912_v16  ;;  %v2945_v35 = vsel %vm374_vm0, %v308_v24, 0  ;;  %v2952_v40 = vpack.c.bf16 %v1896_v34, %v1895_v27  ;;  %v284_v14 = vld [vmem:[%s2763_s13 + $0x68] sm:$0xff]  ;;  %v301_v24 = vld [vmem:[%s2763_s13 + $0x138] sm:$0xff]  ;;  %v306_v20 = vld [vmem:[%s2763_s13 + $0x170] sm:$0xff] }
  0xa5   : > { %2250 = vmatprep.subr.msk.bf16.mxu0 %vm374_vm0, %v2917_v18  ;;  %2051 = vmatprep.mubr.msk.bf16.mxu1 %vm374_vm0, %v2925_v26  ;;  %v311_v21 = vpack.c.bf16 %v284_v14, %v283_v13  ;;  %v3019_v34 = vpack.c.bf16 %v302_v29, %v301_v24  ;;  %v3022_v41 = vsel %vm374_vm0, %v1028_v25, 0  ;;  %v313_v13 = vpack.c.bf16 %v288_v7, %v287_v6  ;;  %v305_v19 = vld [vmem:[%s2763_s13 + $0x168] sm:$0xff] }
  0xa6   : > { %2123 = vmatprep.mubr.msk.bf16.mxu0 %vm374_vm0, %v2929_v28  ;;  %v1030_v14 = vpack.c.bf16 %v1888_v9, %v1887_v8  ;;  %v1906_v25 = vld [vmem:[%s2763_s13 + $0x18a] sm:$0xff]  ;;  %v3067_v29 = vpack.c.bf16 %v306_v20, %v305_v19  ;;  %v591_v6 = vpack.c.bf16 %v560_v62, %v559_v61  ;;  %v608_v8 = vld [vmem:[#allocation2 + $0x8] sm:$0xf]  ;;  %v1186_v9 = vld [vmem:[#allocation2 + $0x18] sm:$0xf]  ;;  %v1212_v20 = vsel %vm374_vm0, %v2912_v16, 0 }
  0xa7   : > { %v3017_v27 = vsel %vm374_vm0, %v311_v21, 0  ;;  %v1905_v21 = vld [vmem:[%s2763_s13 + $0x182] sm:$0xff]  ;;  %v3065_v24 = vsel %vm374_vm0, %v313_v13, 0 }
  0xa8   : > { %v3070_v30 = vsel %vm374_vm0, %v1030_v14, 0  ;;  %v3072_v33 = vpack.c.bf16 %v1906_v25, %v1905_v21  ;;  %v613_v7 = vsel %vm374_vm0, %v591_v6, 0  ;;  %v1939_v13 = vld [vmem:[%s2763_s13 + $0x1a0] sm:$0xff]  ;;  %v1209_v14 = vsel %vm374_vm0, %v2892_v1, 0  ;;  %v753_v1 = vld [vmem:[#allocation2 + $0xc] sm:$0xf] }
  0xa9   : > { %v1330_v21 = vld [vmem:[#allocation2 + $0x1c] sm:$0xf] }
  0xab   : > { %2038 = vmatpush3.bf16.xpose.msra.mxu1 %v2945_v35 }
  0xac   : > { %2110 = vmatpush3.bf16.xpose.msra.mxu0 %v2950_v37  ;;  %2219 = vmatprep.subr.msk.bf16.mxu1 %vm374_vm0, %v2947_v36 }
  0xad   : > { %2251 = vmatprep.subr.msk.bf16.mxu0 %vm374_vm0, %v2952_v40 }
  0xb3   : > { %2040 = vmatpush3.bf16.xpose.msra.mxu1 %v2969_v55 }
  0xb4   : > { %2112 = vmatpush3.bf16.xpose.msra.mxu0 %v2974_v57  ;;  %2220 = vmatprep.subr.msk.bf16.mxu1 %vm374_vm0, %v2971_v56 }
  0xb5   : > { %2252 = vmatprep.subr.msk.bf16.mxu0 %vm374_vm0, %v2976_v58 }
  0xbb   : > { %2042 = vmatpush3.bf16.xpose.msra.mxu1 %v2993_v3 }
  0xbc   : > { %2114 = vmatpush3.bf16.xpose.msra.mxu0 %v2998_v11  ;;  %2221 = vmatprep.subr.msk.bf16.mxu1 %vm374_vm0, %v2995_v10 }
  0xbd   : > { %2253 = vmatprep.subr.msk.bf16.mxu0 %vm374_vm0, %v3000_v12 }
  0xc3   : > { %2044 = vmatpush3.bf16.xpose.msra.mxu1 %v3017_v27 }
  0xc4   : > { %2116 = vmatpush3.bf16.xpose.msra.mxu0 %v3022_v41  ;;  %2222 = vmatprep.subr.msk.bf16.mxu1 %vm374_vm0, %v3019_v34 }
  0xc5   : > { %2254 = vmatprep.subr.msk.bf16.mxu0 %vm374_vm0, %v3024_v42 }
  0xcb   : > { %2046 = vmatpush3.bf16.xpose.msra.mxu1 %v3041_v63 }
  0xcc   : > { %2118 = vmatpush3.bf16.xpose.msra.mxu0 %v3046_v2  ;;  %2223 = vmatprep.subr.msk.bf16.mxu1 %vm374_vm0, %v3043_v0 }
  0xcd   : > { %2255 = vmatprep.subr.msk.bf16.mxu0 %vm374_vm0, %v3048_v5 }
  0xd3   : > { %2048 = vmatpush3.bf16.xpose.msra.mxu1 %v3065_v24 }
  0xd4   : > { %2120 = vmatpush3.bf16.xpose.msra.mxu0 %v3070_v30  ;;  %2224 = vmatprep.subr.msk.bf16.mxu1 %vm374_vm0, %v3067_v29 }
  0xd5   : > { %2256 = vmatprep.subr.msk.bf16.mxu0 %vm374_vm0, %v3072_v33 }
  0xdb   : > { %2050 = vmatpush3.bf16.xpose.msra.mxu1 %v3085_v51 }
  0xdc   : > { %2122 = vmatpush3.bf16.xpose.msra.mxu0 %v3088_v54  ;;  %2225 = vmatprep.subr.msk.bf16.mxu1 %vm374_vm0, %v1031_v50 }
  0xdd   : > { %2257 = vmatprep.subr.msk.bf16.mxu0 %vm374_vm0, %v2947_v36 }
  0xe2   : > { %2052 = vmatmul.mubr.msk.bf16.vlgmr.msra.gmra.mrb[0].mxu1 %vm374_vm0, %v2925_v26 }
  0xe3   : > { %2054 = vmatpush3.bf16.xpose.msra.mxu1 %v613_v7  ;;  %2124 = vmatmul.mubr.msk.bf16.vlgmr.msra.gmra.mrb[0].mxu0 %vm374_vm0, %v2929_v28  ;;  %v1938_v28 = vld [vmem:[%s2763_s13 + $0x198] sm:$0xff] }
  0xe4   : > { %2126 = vmatpush3.bf16.xpose.msra.mxu0 %v2969_v55  ;;  %2226 = vmatprep.subr.msk.bf16.mxu1 %vm374_vm0, %v2896_v4  ;;  %v1936_v4 = vld [vmem:[%s2763_s13 + $0x180] sm:$0xff]  ;;  %v1184_v19 = vpack.c.bf16 %v1939_v13, %v1938_v28 }
  0xe5   : > { %2258 = vmatprep.subr.msk.bf16.mxu0 %vm374_vm0, %v2971_v56  ;;  %2069 = vmatprep.mubr.msk.bf16.mxu1 %vm374_vm0, %v608_v8 }
  0xe6   : > { %2141 = vmatprep.mubr.msk.bf16.mxu0 %vm374_vm0, %v1186_v9 }
  0xeb   : > { %2056 = vmatpush3.bf16.xpose.msra.mxu1 %v2915_v17  ;;  %v1937_v17 = vld [vmem:[%s2763_s13 + $0x188] sm:$0xff] }
  0xec   : > { %2128 = vmatpush3.bf16.xpose.msra.mxu0 %v2993_v3  ;;  %2227 = vmatprep.subr.msk.bf16.mxu1 %vm374_vm0, %v2917_v18  ;;  %v1183_v26 = vpack.c.bf16 %v1937_v17, %v1936_v4 }
  0xed   : > { %2259 = vmatprep.subr.msk.bf16.mxu0 %vm374_vm0, %v2995_v10 }
  0xf3   : > { %2058 = vmatpush3.bf16.xpose.msra.mxu1 %v2950_v37 }
  0xf4   : > { %2130 = vmatpush3.bf16.xpose.msra.mxu0 %v3017_v27  ;;  %2228 = vmatprep.subr.msk.bf16.mxu1 %vm374_vm0, %v2952_v40 }
  0xf5   : > { %2260 = vmatprep.subr.msk.bf16.mxu0 %vm374_vm0, %v3019_v34 }
  0xfb   : > { %2060 = vmatpush3.bf16.xpose.msra.mxu1 %v2974_v57 }
  0xfc   : > { %2132 = vmatpush3.bf16.xpose.msra.mxu0 %v3041_v63  ;;  %2229 = vmatprep.subr.msk.bf16.mxu1 %vm374_vm0, %v2976_v58 }
  0xfd   : > { %2261 = vmatprep.subr.msk.bf16.mxu0 %vm374_vm0, %v3043_v0 }
 0x103   : > { %2062 = vmatpush3.bf16.xpose.msra.mxu1 %v2998_v11 }
 0x104   : > { %2134 = vmatpush3.bf16.xpose.msra.mxu0 %v3065_v24  ;;  %2230 = vmatprep.subr.msk.bf16.mxu1 %vm374_vm0, %v3000_v12 }
 0x105   : > { %2262 = vmatprep.subr.msk.bf16.mxu0 %vm374_vm0, %v3067_v29 }
 0x10b   : > { %2064 = vmatpush3.bf16.xpose.msra.mxu1 %v3022_v41 }
 0x10c   : > { %2136 = vmatpush3.bf16.xpose.msra.mxu0 %v3085_v51  ;;  %2231 = vmatprep.subr.msk.bf16.mxu1 %vm374_vm0, %v3024_v42 }
 0x10d   : > { %2263 = vmatprep.subr.msk.bf16.mxu0 %vm374_vm0, %v1183_v26 }
 0x113   : > { %2066 = vmatpush3.bf16.xpose.msra.mxu1 %v3046_v2 }
 0x114   : > { %2138 = vmatpush3.bf16.xpose.msra.mxu0 %v1209_v14  ;;  %2232 = vmatprep.subr.msk.bf16.mxu1 %vm374_vm0, %v3048_v5 }
 0x115   : > { %2264 = vmatprep.subr.msk.bf16.mxu0 %vm374_vm0, %v1184_v19 }
 0x11b   : > { %2068 = vmatpush3.bf16.xpose.msra.mxu1 %v3070_v30 }
 0x11c   : > { %2140 = vmatpush3.bf16.xpose.msra.mxu0 %v1212_v20  ;;  %2233 = vmatprep.subr.msk.bf16.mxu1 %vm374_vm0, %v2912_v16  ;;  %v2005_v16 = vld [vmem:[%s2763_s13 + $0x1a2] sm:$0xff] }
 0x11d   : > { %2265 = vmatprep.subr.msk.bf16.mxu0 %vm374_vm0, %v2785_v15  ;;  %v1953_v15 = vld [vmem:[%s2763_s13 + $0xc1] sm:$0xff] }
 0x122   : > { %2070 = vmatmul.mubr.msk.bf16.vlgmr.msra.gmra.mrb[0].mxu1 %vm374_vm0, %v608_v8 }
 0x123   : > { %2072 = vmatpush3.bf16.xpose.msra.mxu1 %v2945_v35  ;;  %2142 = vmatmul.mubr.msk.bf16.vlgmr.msra.gmra.mrb[0].mxu0 %vm374_vm0, %v1186_v9  ;;  %v1988_v35 = vld [vmem:[%s2763_s13 + $0xda] sm:$0xff] }
 0x124   : > { %2144 = vmatpush3.bf16.xpose.msra.mxu0 %v2796_v22  ;;  %2234 = vmatprep.subr.msk.bf16.mxu1 %vm374_vm0, %v2947_v36  ;;  %v1954_v22 = vld [vmem:[%s2763_s13 + $0xc9] sm:$0xff] }
 0x125   : > { %2266 = vmatprep.subr.msk.bf16.mxu0 %vm374_vm0, %v2798_v23  ;;  %2087 = vmatprep.mubr.msk.bf16.mxu1 %vm374_vm0, %v753_v1  ;;  %v1319_v23 = vpack.c.bf16 %v1954_v22, %v1953_v15  ;;  %v1989_v36 = vld [vmem:[%s2763_s13 + $0xe2] sm:$0xff] }
 0x126   : > { %2159 = vmatprep.mubr.msk.bf16.mxu0 %vm374_vm0, %v1330_v21 }
 0x12b   : > { %2074 = vmatpush3.bf16.xpose.msra.mxu1 %v2969_v55 }
 0x12c   : > { %2146 = vmatpush3.bf16.xpose.msra.mxu0 %v2818_v31  ;;  %2235 = vmatprep.subr.msk.bf16.mxu1 %vm374_vm0, %v2971_v56  ;;  %v1971_v31 = vld [vmem:[%s2763_s13 + $0x199] sm:$0xff] }
 0x12d   : > { %2267 = vmatprep.subr.msk.bf16.mxu0 %vm374_vm0, %v2820_v32  ;;  %v1972_v32 = vld [vmem:[%s2763_s13 + $0x1a1] sm:$0xff] }
 0x133   : > { %2076 = vmatpush3.bf16.xpose.msra.mxu1 %v2993_v3 }
 0x134   : > { %2148 = vmatpush3.bf16.xpose.msra.mxu0 %v2833_v38  ;;  %2236 = vmatprep.subr.msk.bf16.mxu1 %vm374_vm0, %v2995_v10  ;;  %v1353_v38 = vsel %vm374_vm0, %v1319_v23, 0 }
 0x135   : > { %2268 = vmatprep.subr.msk.bf16.mxu0 %vm374_vm0, %v2835_v39  ;;  %v1328_v39 = vpack.c.bf16 %v1972_v32, %v1971_v31 }
 0x13b   : > { %2078 = vmatpush3.bf16.xpose.msra.mxu1 %v3017_v27 }
 0x13c   : > { %2150 = vmatpush3.bf16.xpose.msra.mxu0 %v2848_v45  ;;  %2237 = vmatprep.subr.msk.bf16.mxu1 %vm374_vm0, %v3019_v34  ;;  %v1955_v45 = vld [vmem:[%s2763_s13 + $0xd9] sm:$0xff] }
 0x13d   : > { %2269 = vmatprep.subr.msk.bf16.mxu0 %vm374_vm0, %v2850_v46  ;;  %v1956_v46 = vld [vmem:[%s2763_s13 + $0xe1] sm:$0xff] }
 0x143   : > { %2080 = vmatpush3.bf16.xpose.msra.mxu1 %v3041_v63 }
 0x144   : > { %2152 = vmatpush3.bf16.xpose.msra.mxu0 %v2863_v52  ;;  %2238 = vmatprep.subr.msk.bf16.mxu1 %vm374_vm0, %v3043_v0  ;;  %v1320_v52 = vpack.c.bf16 %v1956_v46, %v1955_v45 }
 0x145   : > { %2270 = vmatprep.subr.msk.bf16.mxu0 %vm374_vm0, %v2865_v53 }
 0x146   : > { %v1356_v53 = vsel %vm374_vm0, %v1320_v52, 0 }
 0x14b   : > { %2082 = vmatpush3.bf16.xpose.msra.mxu1 %v3065_v24 }
 0x14c   : > { %2154 = vmatpush3.bf16.xpose.msra.mxu0 %v2878_v59  ;;  %2239 = vmatprep.subr.msk.bf16.mxu1 %vm374_vm0, %v3067_v29  ;;  %v1474_v59 = vld [vmem:[#allocation2 + $0x20] sm:$0xf] }
 0x14d   : > { %2271 = vmatprep.subr.msk.bf16.mxu0 %vm374_vm0, %v2880_v60  ;;  %v2004_v60 = vld [vmem:[%s2763_s13 + $0x19a] sm:$0xff] }
 0x153   : > { %2084 = vmatpush3.bf16.xpose.msra.mxu1 %v3085_v51 }
 0x154   : > { %2156 = vmatpush3.bf16.xpose.msra.mxu0 %v1353_v38  ;;  %2240 = vmatprep.subr.msk.bf16.mxu1 %vm374_vm0, %v1183_v26 }
 0x155   : > { %2272 = vmatprep.subr.msk.bf16.mxu0 %vm374_vm0, %v1328_v39 }
 0x15b   : > { %2086 = vmatpush3.bf16.xpose.msra.mxu1 %v1209_v14 }
 0x15c   : > { %2158 = vmatpush3.bf16.xpose.msra.mxu0 %v1356_v53 }
 0x15d   : > { %2273 = vmatprep.subr.msk.bf16.mxu0 %vm374_vm0, %v2917_v18  ;;  %v1472_v18 = vpack.c.bf16 %v2005_v16, %v2004_v60 }
 0x162   : > { %2088 = vmatmul.mubr.msk.bf16.vlgmr.msra.gmra.mrb[0].mxu1 %vm374_vm0, %v753_v1 }
 0x163   : > { %2160 = vmatmul.mubr.msk.bf16.vlgmr.msra.gmra.mrb[0].mxu0 %vm374_vm0, %v1330_v21 }
 0x164   : > { %2162 = vmatpush3.bf16.xpose.msra.mxu0 %v2950_v37  ;;  %2177 = vmatprep.mubr.msk.bf16.mxu0 %vm374_vm0, %v1474_v59  ;;  %v1464_v37 = vpack.c.bf16 %v1989_v36, %v1988_v35 }
 0x165   : > { %2274 = vmatprep.subr.msk.bf16.mxu0 %vm374_vm0, %v2952_v40 }
 0x166   : > { %v1500_v40 = vsel %vm374_vm0, %v1464_v37, 0 }
 0x16c   : > { %2164 = vmatpush3.bf16.xpose.msra.mxu0 %v2974_v57 }
 0x16d   : > { %2275 = vmatprep.subr.msk.bf16.mxu0 %vm374_vm0, %v2976_v58 }
 0x174   : > { %2166 = vmatpush3.bf16.xpose.msra.mxu0 %v2998_v11 }
 0x175   : > { %2276 = vmatprep.subr.msk.bf16.mxu0 %vm374_vm0, %v3000_v12 }
 0x17c   : > { %2168 = vmatpush3.bf16.xpose.msra.mxu0 %v3022_v41 }
 0x17d   : > { %2277 = vmatprep.subr.msk.bf16.mxu0 %vm374_vm0, %v3024_v42 }
 0x184   : > { %2170 = vmatpush3.bf16.xpose.msra.mxu0 %v3046_v2 }
 0x185   : > { %2278 = vmatprep.subr.msk.bf16.mxu0 %vm374_vm0, %v3048_v5 }
 0x18c   : > { %2172 = vmatpush3.bf16.xpose.msra.mxu0 %v3070_v30 }
 0x18d   : > { %2279 = vmatprep.subr.msk.bf16.mxu0 %vm374_vm0, %v3072_v33 }
 0x194   : > { %2174 = vmatpush3.bf16.xpose.msra.mxu0 %v3088_v54 }
 0x195   : > { %2280 = vmatprep.subr.msk.bf16.mxu0 %vm374_vm0, %v1472_v18 }
 0x19c   : > { %2176 = vmatpush3.bf16.xpose.msra.mxu0 %v1500_v40 }
 0x1a3   : > { %2178 = vmatmul.mubr.msk.bf16.vlgmr.msra.gmra.mrb[0].mxu0 %vm374_vm0, %v1474_v59 }
 0x235   : > { %v839_v55 = vpop.f32.mrb[0].mxu1 }
 0x236   : > { %v841_v56 = vpop.f32.mrb[1].mxu1 }
 0x237   : > { %v843_v57 = vpop.f32.mrb[2].mxu1 }
 0x238   : > { %v844_v58 = vpop.f32.mrb[3].mxu1 }
 0x276   : > { %v1560_v3 = vpop.f32.mrb[0].mxu0 }
 0x277   : > { %v2179_v10 = vadd.f32 %v1560_v3, %v839_v55  ;;  %v1562_v11 = vpop.f32.mrb[1].mxu0 }
 0x278   : > { %v2180_v12 = vadd.f32 %v1562_v11, %v841_v56  ;;  %v1564_v27 = vpop.f32.mrb[2].mxu0 }
 0x279   : > { %1569 = vst [vmem:[%s259_s25] sm:$0xff] %v2179_v10  ;;  %v1565_v34 = vpop.f32.mrb[3].mxu0  ;;  %v1576_v41 = vmul.f32 %v2179_v10, %v2179_v10 }
 0x27a   : > { %1570 = vst [vmem:[%s259_s25 + $0x8] sm:$0xff] %v2180_v12  ;;  %v1571_v42 = vadd.f32 %v2180_v12, %v2179_v10  ;;  %v1577_v63 = vmul.f32 %v2180_v12, %v2180_v12 }
 0x27c   : > { %1572 = vadd.xlane.f32.xlu0 %v1571_v42  ;;  %v1578_v0 = vadd.f32 %v1577_v63, %v1576_v41 }
 0x280   : > { %1579 = vadd.xlane.f32.xlu0 %v1578_v0 }
 0x281   : > { %2442 = shalt.err (!%p2439_p9)
}
 0x282   : > { %s2443_s13 = scalar_lea.hbm %s3242_s6, 256  ;;  %s2447_s10 = scalar_lea.hbm %s3364_s2, 512 }
 0x283   : > { %p2444_p1 = scmp.ne.s32.totalorder %s3242_s6, %s2443_s13  ;;  %p2448_p7 = scmp.lt.u32.totalorder %s3242_s6, %s3364_s2 }
 0x284   : > { %p2449_p4 = scmp.lt.u32.totalorder %s2447_s10, %s2443_s13  ;;  %p2451_p6 = scmp.lt.u32.totalorder %s2443_s13, %s3242_s6 }
 0x285   : > { %p2445_p2 = pnand %p2444_p1, %p2701_p10 }
 0x286   : > { %p2450_p11 = por %p2449_p4, %p2448_p7 }
 0x287   : > { %p2446_p3 = pneg %p2445_p2 }
 0x288   : > { %p2452_p8 = por %p2451_p6, %p2450_p11 }
 0x28a   : > { %p2453_p12 = pnand %p2452_p8, %p2446_p3 }
 0x28c   : > { %2456 = shalt.err (!%p2453_p12)
}
 0x28d   : > { %2290 = dma.vmem_to_hbm [thread:$0]  (%p2701_p10), %s1610_s11, 256, %s3242_s6, %s1583_s7   ;;  %vm1574_vm1 = vcmask 7168  }
 0x28e   : > { %s1804_s30 = sshll.u32 %s2759_s9, 3  ;;  %s1587_s27 = sand.u32 1, %s2642_s21  }
 0x28f   : > { %s2012_s12 = sshll.u32 %s2567_s18, 7  ;;  %s266_s28 = scalar_lea.vmem [#allocation8], %s1804_s30 }
 0x290   : > { %s1623_s23 = sshll.u32 %s266_s28, 4  ;;  %s3270_s10 = scalar_lea.hbm %s3365_s3, %s2012_s12  ;;  %s3272_s23 = int_to_ptr.vmem [resolvable:$true] %s1623_s23 }
 0x291   : > { %s3274_s11 = scalar_lea.vmem [#allocation10], %s1804_s30  ;;  %s3278_s9 = scalar_lea.sflag [#allocation9], %s1587_s27 }
 0x292   : > { %s1637_s21 = sshll.u32 %s3274_s11, 4  ;;  %s2457_s6 = scalar_lea.vmem %s3272_s23, 128  ;;  %s3311_s21 = int_to_ptr.vmem [resolvable:$true] %s1637_s21 }
 0x293   : > { %p2458_p13 = scmp.ne.s32.totalorder %s3272_s23, %s2457_s6  ;;  %s2584_s7 = smov [#allocation8]  }
 0x294   : > { %s2461_s14 = sshll.u32 %s2584_s7, 4  ;;  %s2462_s14 = int_to_ptr.vmem [resolvable:$false] %s2461_s14 }
 0x295   : > { %p2459_p0 = pnand %p2458_p13, %p2701_p10  ;;  %s2463_s26 = scalar_lea.vmem %s2462_s14, 256 }
 0x296   : > { %p2464_p9 = scmp.lt.s32.totalorder %s3272_s23, %s2462_s14  ;;  %p2465_p1 = scmp.lt.s32.totalorder %s2463_s26, %s2457_s6 }
 0x297   : > { %p2460_p5 = pneg %p2459_p0 }
 0x298   : > { %p2466_p2 = por %p2465_p1, %p2464_p9 }
 0x29a   : > { %p2467_p3 = pnand %p2466_p2, %p2460_p5 }
 0x309   : > { %v1573_v2 = vpop.xlane.xlu0 %1572 }
 0x30a   : > { %1575 = vst.msk [vmem:[%s266_s28] sm:$0xff] %vm1574_vm1, %v1573_v2 }
 0x30b   : > { %2470 = shalt.err (!%p2467_p3)
}
 0x30c   : > { %s2471_s30 = scalar_lea.hbm %s3270_s10, 128  ;;  %s2475_s13 = scalar_lea.hbm %s3365_s3, 256 }
 0x30d   : > { %p2472_p7 = scmp.ne.s32.totalorder %s3270_s10, %s2471_s30  ;;  %p2476_p6 = scmp.lt.u32.totalorder %s3270_s10, %s3365_s3 }
 0x30e   : > { %p2477_p8 = scmp.lt.u32.totalorder %s2475_s13, %s2471_s30  ;;  %p2479_p13 = scmp.lt.u32.totalorder %s2471_s30, %s3270_s10 }
 0x30f   : > { %p2473_p4 = pnand %p2472_p7, %p2701_p10 }
 0x310   : > { %p2478_p12 = por %p2477_p8, %p2476_p6 }
 0x311   : > { %p2474_p11 = pneg %p2473_p4 }
 0x312   : > { %p2480_p0 = por %p2479_p13, %p2478_p12 }
 0x314   : > { %p2481_p5 = pnand %p2480_p0, %p2474_p11 }
 0x316   : > { %2484 = shalt.err (!%p2481_p5)
}
 0x317   : > { %2291 = dma.vmem_to_hbm [thread:$0]  (%p2701_p10), %s3272_s23, 128, %s3270_s10, %s3278_s9   ;;  %v1580_v5 = vpop.xlane.xlu0 %1579 }
 0x318   : > { %s3307_s26 = scalar_lea.hbm %s3366_s4, %s2012_s12  ;;  %1581 = vst.msk [vmem:[%s3274_s11] sm:$0xff] %vm1574_vm1, %v1580_v5  ;;  %s2485_s30 = scalar_lea.vmem %s3311_s21, 128 }
 0x319   : > { %p2486_p9 = scmp.ne.s32.totalorder %s3311_s21, %s2485_s30  ;;  %s2585_s18 = smov [#allocation10]  }
 0x31a   : > { %s2489_s23 = sshll.u32 %s2585_s18, 4  ;;  %s2490_s23 = int_to_ptr.vmem [resolvable:$false] %s2489_s23 }
 0x31b   : > { %p2487_p1 = pnand %p2486_p9, %p2701_p10  ;;  %s2491_s10 = scalar_lea.vmem %s2490_s23, 256 }
 0x31c   : > { %p2492_p3 = scmp.lt.s32.totalorder %s3311_s21, %s2490_s23  ;;  %p2493_p7 = scmp.lt.s32.totalorder %s2491_s10, %s2485_s30 }
 0x31d   : > { %p2488_p2 = pneg %p2487_p1 }
 0x31e   : > { %p2494_p4 = por %p2493_p7, %p2492_p3 }
 0x320   : > { %p2495_p11 = pnand %p2494_p4, %p2488_p2 }
 0x322   : > { %2498 = shalt.err (!%p2495_p11)
}
 0x323   : > { %s2499_s12 = scalar_lea.hbm %s3307_s26, 128  ;;  %s2503_s28 = scalar_lea.hbm %s3366_s4, 256 }
 0x324   : > { %p2500_p6 = scmp.ne.s32.totalorder %s3307_s26, %s2499_s12  ;;  %p2504_p13 = scmp.lt.u32.totalorder %s3307_s26, %s3366_s4 }
 0x325   : > { %p2505_p0 = scmp.lt.u32.totalorder %s2503_s28, %s2499_s12  ;;  %p2507_p9 = scmp.lt.u32.totalorder %s2499_s12, %s3307_s26 }
 0x326   : > { %p2501_p8 = pnand %p2500_p6, %p2701_p10 }
 0x327   : > { %p2506_p5 = por %p2505_p0, %p2504_p13 }
 0x328   : > { %p2502_p12 = pneg %p2501_p8 }
 0x329   : > { %p2508_p1 = por %p2507_p9, %p2506_p5 }
 0x32b   : > { %p2509_p2 = pnand %p2508_p1, %p2502_p12 }
 0x32d   : > { %2512 = shalt.err (!%p2509_p2)
}
 0x32e   : > { %2292 = dma.vmem_to_hbm [thread:$0]  (%p2701_p10), %s3311_s21, 128, %s3307_s26, %s3278_s9  }
 0x32f PF: > { %s1649_s7 = sand.u32 1, %s2555_s15   ;;  %p3381_p3 = scmp.ne.s32.totalorder %s3371_s24, 0 }
 0x330   : > { %p3382_p7 = scmp.ge.s32.totalorder %s2575_s20, 2  ;;  %s1650_s6 = scalar_lea.sflag [#allocation4], %s1649_s7 }
 0x332   : > { %p2305_p4 = pnand %p3382_p7, %p3381_p3 }
 0x334   : > { %2546 = dma.done.wait (!%p2305_p4), %s1650_s6, 256  }
 0x335   : > { %2548 = vsyncadd (!%p2305_p4), %s1650_s6, 4294967040  ;;  %s1658_s14 = sand.u32 1, %s1796_s22  }
 0x336   : > { %s1659_s30 = scalar_lea.sflag [#allocation9], %s1658_s14 }
 0x337   : > { %2550 = dma.done.wait (!%p2305_p4), %s1659_s30, 256  }
 0x338   : > { %2552 = vsyncadd (!%p2305_p4), %s1659_s30, 4294967040  ;;  %s25_s20 = sadd.s32 1, %s2575_s20   ;;  %s3383_s15 = smov %s2559_s16 }
 0x339   : > { %p22_p10 = scmp.ge.s32.totalorder %s25_s20, 4   ;;  %s3384_s16 = smov %s2563_s17 }
 0x33a   : > { %s3385_s17 = smov %s2710_s8  ;;  %s3386_s18 = smov %s2571_s19 }
 0x33b   : > { %s3387_s19 = smov %s3389_s29  ;;  %24 = sbr.rel (!%p22_p10) target bundleno = 9 (0x9), region = 121 }
 0x342   :  { %1673 = vsyncpa [#allocation3], 1 }
 0x343   :  { %1675 = vsyncpa [#allocation3 + $0x1], 1 }
 0x344   :  { %1676 = vsyncpa [#allocation6], 1 }
 0x345   :  { %1678 = vsyncpa [#allocation6 + $0x1], 1 }
 0x346   :  { %1679 = vsyncpa [#allocation4], 1 }
 0x347   :  { %1681 = vsyncpa [#allocation4 + $0x1], 1 }
 0x348   :  { %1682 = vsyncpa [#allocation9], 1 }
 0x349   :  { %1684 = vsyncpa [#allocation9 + $0x1], 1 }

</bundles_post_ra>
